<compile_context>
chip_gen: v7x
topology: tpu7x:2x2x1
jax: 0.10.0
libtpu: 0.0.40
codegen_flags: <defaults>
</compile_context>

<pallas_src>
import functools

import jax
import jax.numpy as jnp
from jax.experimental import pallas as pl
from jax.experimental.pallas import tpu as pltpu


def _dfsmn_kernel(x_ref, we_ref, be_ref, ws_ref, wl_ref, wr_ref, o_ref, pad_ref,
                  *, lorder, rorder, t_real, add_residual):
    Bb, Tp, _Din = x_ref.shape
    Dout = o_ref.shape[-1]

    # ---- load activations; flatten (Bb, Tp) rows so the MXU M-dim is full ----
    x = x_ref[...]                                        # (Bb, Tp, Din)  f32
    x2d = x.reshape(Bb * Tp, x.shape[-1])

    # ---- AffineTransform (expand) + bias + ReLU: bf16 MXU inputs, f32 acc ----
    h = jnp.dot(x2d.astype(jnp.bfloat16), we_ref[...],
                preferred_element_type=jnp.float32) + be_ref[...]
    h = jnp.maximum(h, 0.0)                               # (Bb*Tp, Dexp) f32

    # ---- LinearTransform (shrink, no bias) -----------------------------------
    p2d = jnp.dot(h.astype(jnp.bfloat16), ws_ref[...],
                  preferred_element_type=jnp.float32)     # (Bb*Tp, Dout) f32
    p = p2d.reshape(Bb, Tp, Dout)

    # Padded time rows must act like the conv's zero padding.
    if t_real != Tp:
        t_idx = jax.lax.broadcasted_iota(jnp.int32, p.shape, 1)
        p = jnp.where(t_idx < t_real, p, 0.0)

    # ---- FSMN memory (depthwise temporal conv, lstride = rstride = 1) --------
    # padded[j] = p[j - (lorder-1)], zeros outside.  Then:
    #   left  tap k: p[t - (lorder-1-k)] == padded[t + k]
    #   right tap k: p[t + 1 + k]        == padded[t + lorder + k]
    left = lorder - 1
    if left > 0:
        pad_ref[:, :left, :] = jnp.zeros((Bb, left, Dout), jnp.float32)
    if rorder > 0:
        pad_ref[:, left + Tp:, :] = jnp.zeros((Bb, rorder, Dout), jnp.float32)
    pad_ref[:, left:left + Tp, :] = p

    wl = wl_ref[...]                                      # (lorder, Dout)     f32
    wr = wr_ref[...]                                      # (max(rorder,1), Dout)

    out = p                                               # identity term
    for k in range(lorder):
        w_row = wl[k:k + 1, :].reshape(1, 1, Dout)
        out = out + w_row * pad_ref[:, k:k + Tp, :]
    for k in range(rorder):
        w_row = wr[k:k + 1, :].reshape(1, 1, Dout)
        out = out + w_row * pad_ref[:, lorder + k:lorder + k + Tp, :]

    # ---- residual connection (only when dimin == dimout) ---------------------
    if add_residual:
        out = out + x

    o_ref[...] = out.astype(o_ref.dtype)


def dfsmn_unit(x, we_t, be, ws_t, wl, wr, *, rows_target=256):
    """x: (B, T, Din); we_t: (Din, Dexp); be: (1, Dexp); ws_t: (Dexp, Dout);
    wl: (lorder, Dout); wr: (rorder, Dout)."""
    B, T, Din = x.shape
    Dexp = we_t.shape[1]
    Dout = ws_t.shape[1]
    lorder = wl.shape[0]
    rorder = wr.shape[0]
    assert lorder >= 1
    add_residual = (Din == Dout)

    # Lane-dense / sublane-aligned padding: features -> x128, time -> x8.
    Tp = -(-T // 8) * 8
    Din_p = -(-Din // 128) * 128
    Dexp_p = -(-Dexp // 128) * 128
    Dout_p = -(-Dout // 128) * 128

    # Batch tiling: fill the MXU M-dim (>= rows_target rows per step) while
    # keeping >= 2 parallel grid steps when possible (v7x has 2 TensorCores).
    Bb = min(B, max(1, rows_target // Tp))
    if B > 1 and -(-B // Bb) < 2:
        Bb = -(-B // 2)
    nb = -(-B // Bb)
    Bp = nb * Bb

    f32 = jnp.float32
    xp = jnp.pad(x.astype(f32), ((0, Bp - B), (0, Tp - T), (0, Din_p - Din)))
    we_p = jnp.pad(we_t, ((0, Din_p - Din), (0, Dexp_p - Dexp))).astype(jnp.bfloat16)
    be_p = jnp.pad(be, ((0, 0), (0, Dexp_p - Dexp))).astype(f32)
    ws_p = jnp.pad(ws_t, ((0, Dexp_p - Dexp), (0, Dout_p - Dout))).astype(jnp.bfloat16)
    wl_p = jnp.pad(wl, ((0, 0), (0, Dout_p - Dout))).astype(f32)
    r_rows = max(rorder, 1)
    wr_p = jnp.pad(wr, ((0, r_rows - rorder), (0, Dout_p - Dout))).astype(f32)

    kernel = functools.partial(_dfsmn_kernel, lorder=lorder, rorder=rorder,
                               t_real=T, add_residual=add_residual)
    scratch_len = (lorder - 1) + Tp + rorder

    out = pl.pallas_call(
        kernel,
        out_shape=jax.ShapeDtypeStruct((Bp, Tp, Dout_p), jnp.float32),
        grid=(nb,),
        in_specs=[
            pl.BlockSpec((Bb, Tp, Din_p), lambda b: (b, 0, 0)),
            pl.BlockSpec((Din_p, Dexp_p), lambda b: (0, 0)),
            pl.BlockSpec((1, Dexp_p), lambda b: (0, 0)),
            pl.BlockSpec((Dexp_p, Dout_p), lambda b: (0, 0)),
            pl.BlockSpec((lorder, Dout_p), lambda b: (0, 0)),
            pl.BlockSpec((r_rows, Dout_p), lambda b: (0, 0)),
        ],
        out_specs=pl.BlockSpec((Bb, Tp, Dout_p), lambda b: (b, 0, 0)),
        scratch_shapes=[pltpu.VMEM((Bb, scratch_len, Dout_p), jnp.float32)],
        compiler_params=pltpu.CompilerParams(
            dimension_semantics=("parallel",),
            vmem_limit_bytes=32 * 1024 * 1024),
    )(xp, we_p, be_p, ws_p, wl_p, wr_p)

    return out[:B, :T, :Dout].astype(x.dtype)


def dfsmn_unit_ref(x, we_t, be, ws_t, wl, wr):
    """Pure-JAX f32 reference matching the PyTorch forward semantics."""
    h = jax.nn.relu(x @ we_t + be)
    p = h @ ws_t
    B, T, D = p.shape
    lorder, rorder = wl.shape[0], wr.shape[0]
    out = p
    for k in range(lorder):
        delay = lorder - 1 - k
        shifted = jnp.pad(p, ((0, 0), (delay, 0), (0, 0)))[:, :T, :]
        out = out + wl[k][None, None, :] * shifted
    for k in range(rorder):
        adv = 1 + k
        shifted = jnp.pad(p, ((0, 0), (0, adv), (0, 0)))[:, adv:, :]
        out = out + wr[k][None, None, :] * shifted
    if x.shape[-1] == out.shape[-1]:
        out = x + out
    return out


if __name__ == "__main__":
    # Small shapes consistent with DFSMNUnit(dimin, dimexpand, dimout, lorder, rorder)
    B, T = 2, 16
    dimin, dimexpand, dimout = 32, 64, 32
    lorder, rorder = 4, 1

    key = jax.random.PRNGKey(0)
    kx, ke, kb, ks, kl, kr = jax.random.split(key, 6)

    x = jax.random.normal(kx, (B, T, dimin), dtype=jnp.float32)
    # expand: nn.Linear(dimin, dimexpand) -> weight.T (dimin, dimexpand), bias (1, dimexpand)
    we_t = jax.random.normal(ke, (dimin, dimexpand), dtype=jnp.float32) * 0.1
    be = jax.random.normal(kb, (1, dimexpand), dtype=jnp.float32) * 0.1
    # shrink: nn.Linear(dimexpand, dimout, bias=False) -> weight.T (dimexpand, dimout)
    ws_t = jax.random.normal(ks, (dimexpand, dimout), dtype=jnp.float32) * 0.1
    # fsmn depthwise conv weights: conv_left (dimout,1,lorder,1), conv_right (dimout,1,rorder,1)
    wl = jax.random.normal(kl, (lorder, dimout), dtype=jnp.float32) * 0.1
    wr = jax.random.normal(kr, (rorder, dimout), dtype=jnp.float32) * 0.1

    out = jax.block_until_ready(dfsmn_unit(x, we_t, be, ws_t, wl, wr))
    ref = dfsmn_unit_ref(x, we_t, be, ws_t, wl, wr)

    assert out.shape == (B, T, dimout)
    err = float(jnp.max(jnp.abs(out - ref)))
    # bf16 MXU inputs with f32 accumulation -> loosened tolerance vs f32 reference.
    assert err < 5e-2, f"max abs err {err}"

    print("KERNEL_OK")
</pallas_src>

<mosaic_0001>
module attributes {stable_mosaic.version = 11 : i64} {
  func.func @_dfsmn_kernel(%arg0: i32, %arg1: memref<1x16x128xf32, #tpu.memory_space<vmem>>, %arg2: memref<128x128xbf16, #tpu.memory_space<vmem>>, %arg3: memref<1x128xf32, #tpu.memory_space<vmem>>, %arg4: memref<128x128xbf16, #tpu.memory_space<vmem>>, %arg5: memref<4x128xf32, #tpu.memory_space<vmem>>, %arg6: memref<1x128xf32, #tpu.memory_space<vmem>>, %arg7: memref<1x16x128xf32, #tpu.memory_space<vmem>>, %arg8: memref<1x20x128xf32, #tpu.memory_space<vmem>>) attributes {dimension_semantics = [#tpu.dimension_semantics<parallel>], iteration_bounds = array<i64: 2>, scalar_prefetch = 0 : i64, scratch_operands = 1 : i64, tpu.core_type = #tpu.core_type<tc>, window_params = [{transform_indices = @transform_0, window_bounds = array<i64: 1, 16, 128>}, {pipeline_mode = #tpu.pipeline_mode<synchronous>, transform_indices = @transform_1, window_bounds = array<i64: 128, 128>}, {pipeline_mode = #tpu.pipeline_mode<synchronous>, transform_indices = @transform_2, window_bounds = array<i64: 1, 128>}, {pipeline_mode = #tpu.pipeline_mode<synchronous>, transform_indices = @transform_3, window_bounds = array<i64: 128, 128>}, {pipeline_mode = #tpu.pipeline_mode<synchronous>, transform_indices = @transform_4, window_bounds = array<i64: 4, 128>}, {pipeline_mode = #tpu.pipeline_mode<synchronous>, transform_indices = @transform_5, window_bounds = array<i64: 1, 128>}, {transform_indices = @transform_6, window_bounds = array<i64: 1, 16, 128>}]} {
    %c0 = arith.constant 0 : index
    %c0_0 = arith.constant 0 : index
    %c0_1 = arith.constant 0 : index
    %0 = vector.load %arg1[%c0, %c0_0, %c0_1] : memref<1x16x128xf32, #tpu.memory_space<vmem>>, vector<1x16x128xf32>
    %1 = vector.shape_cast %0 : vector<1x16x128xf32> to vector<16x128xf32>
    %2 = arith.truncf %1 : vector<16x128xf32> to vector<16x128xbf16>
    %c0_2 = arith.constant 0 : index
    %c0_3 = arith.constant 0 : index
    %3 = vector.load %arg2[%c0_2, %c0_3] : memref<128x128xbf16, #tpu.memory_space<vmem>>, vector<128x128xbf16>
    %cst = arith.constant dense<0.000000e+00> : vector<16x128xf32>
    %4 = tpu.matmul %2, %3, %cst {dimension_numbers = #tpu.dot_dimension_numbers<[1], [0], [0], [1], [0, 0, 1, 1], [], []>} : vector<16x128xbf16>, vector<128x128xbf16>, vector<16x128xf32> -> vector<16x128xf32>
    %c0_4 = arith.constant 0 : index
    %c0_5 = arith.constant 0 : index
    %5 = vector.load %arg3[%c0_4, %c0_5] : memref<1x128xf32, #tpu.memory_space<vmem>>, vector<1x128xf32>
    %6 = vector.broadcast %5 : vector<1x128xf32> to vector<16x128xf32>
    %7 = arith.addf %4, %6 : vector<16x128xf32>
    %cst_6 = arith.constant 0.000000e+00 : f32
    %8 = vector.broadcast %cst_6 : f32 to vector<16x128xf32>
    %9 = arith.maximumf %7, %8 : vector<16x128xf32>
    %10 = arith.truncf %9 : vector<16x128xf32> to vector<16x128xbf16>
    %c0_7 = arith.constant 0 : index
    %c0_8 = arith.constant 0 : index
    %11 = vector.load %arg4[%c0_7, %c0_8] : memref<128x128xbf16, #tpu.memory_space<vmem>>, vector<128x128xbf16>
    %cst_9 = arith.constant dense<0.000000e+00> : vector<16x128xf32>
    %12 = tpu.matmul %10, %11, %cst_9 {dimension_numbers = #tpu.dot_dimension_numbers<[1], [0], [0], [1], [0, 0, 1, 1], [], []>} : vector<16x128xbf16>, vector<128x128xbf16>, vector<16x128xf32> -> vector<16x128xf32>
    %13 = vector.shape_cast %12 : vector<16x128xf32> to vector<1x16x128xf32>
    %cst_10 = arith.constant 0.000000e+00 : f32
    %14 = vector.broadcast %cst_10 : f32 to vector<1x3x128xf32>
    %c0_11 = arith.constant 0 : index
    %c0_12 = arith.constant 0 : index
    %c0_13 = arith.constant 0 : index
    %15 = vector.load %arg8[%c0_11, %c0_12, %c0_13] : memref<1x20x128xf32, #tpu.memory_space<vmem>>, vector<1x3x128xf32>
    tpu.vector_store %arg8[%c0_11, %c0_12, %c0_13], %14 {strides = array<i32>} : memref<1x20x128xf32, #tpu.memory_space<vmem>>, vector<1x3x128xf32>,
    %cst_14 = arith.constant 0.000000e+00 : f32
    %16 = vector.broadcast %cst_14 : f32 to vector<1x1x128xf32>
    %c0_15 = arith.constant 0 : index
    %c19 = arith.constant 19 : index
    %c0_16 = arith.constant 0 : index
    %17 = vector.load %arg8[%c0_15, %c19, %c0_16] : memref<1x20x128xf32, #tpu.memory_space<vmem>>, vector<1x1x128xf32>
    tpu.vector_store %arg8[%c0_15, %c19, %c0_16], %16 {strides = array<i32>} : memref<1x20x128xf32, #tpu.memory_space<vmem>>, vector<1x1x128xf32>,
    %c0_17 = arith.constant 0 : index
    %c3 = arith.constant 3 : index
    %c0_18 = arith.constant 0 : index
    %18 = vector.load %arg8[%c0_17, %c3, %c0_18] : memref<1x20x128xf32, #tpu.memory_space<vmem>>, vector<1x16x128xf32>
    tpu.vector_store %arg8[%c0_17, %c3, %c0_18], %13 {strides = array<i32>} : memref<1x20x128xf32, #tpu.memory_space<vmem>>, vector<1x16x128xf32>,
    %c0_19 = arith.constant 0 : index
    %c0_20 = arith.constant 0 : index
    %19 = vector.load %arg5[%c0_19, %c0_20] : memref<4x128xf32, #tpu.memory_space<vmem>>, vector<4x128xf32>
    %c0_21 = arith.constant 0 : index
    %c0_22 = arith.constant 0 : index
    %20 = vector.load %arg6[%c0_21, %c0_22] : memref<1x128xf32, #tpu.memory_space<vmem>>, vector<1x128xf32>
    %21 = vector.extract_strided_slice %19 {offsets = [0, 0], sizes = [1, 128], strides = [1, 1]} : vector<4x128xf32> to vector<1x128xf32>
    %22 = vector.shape_cast %21 : vector<1x128xf32> to vector<1x1x128xf32>
    %c0_23 = arith.constant 0 : index
    %c0_24 = arith.constant 0 : index
    %c0_25 = arith.constant 0 : index
    %23 = vector.load %arg8[%c0_23, %c0_24, %c0_25] : memref<1x20x128xf32, #tpu.memory_space<vmem>>, vector<1x16x128xf32>
    %24 = vector.broadcast %22 : vector<1x1x128xf32> to vector<1x16x128xf32>
    %25 = arith.mulf %24, %23 : vector<1x16x128xf32>
    %26 = arith.addf %13, %25 : vector<1x16x128xf32>
    %27 = vector.extract_strided_slice %19 {offsets = [1, 0], sizes = [1, 128], strides = [1, 1]} : vector<4x128xf32> to vector<1x128xf32>
    %28 = vector.shape_cast %27 : vector<1x128xf32> to vector<1x1x128xf32>
    %c0_26 = arith.constant 0 : index
    %c1 = arith.constant 1 : index
    %c0_27 = arith.constant 0 : index
    %29 = vector.load %arg8[%c0_26, %c1, %c0_27] : memref<1x20x128xf32, #tpu.memory_space<vmem>>, vector<1x16x128xf32>
    %30 = vector.broadcast %28 : vector<1x1x128xf32> to vector<1x16x128xf32>
    %31 = arith.mulf %30, %29 : vector<1x16x128xf32>
    %32 = arith.addf %26, %31 : vector<1x16x128xf32>
    %33 = vector.extract_strided_slice %19 {offsets = [2, 0], sizes = [1, 128], strides = [1, 1]} : vector<4x128xf32> to vector<1x128xf32>
    %34 = vector.shape_cast %33 : vector<1x128xf32> to vector<1x1x128xf32>
    %c0_28 = arith.constant 0 : index
    %c2 = arith.constant 2 : index
    %c0_29 = arith.constant 0 : index
    %35 = vector.load %arg8[%c0_28, %c2, %c0_29] : memref<1x20x128xf32, #tpu.memory_space<vmem>>, vector<1x16x128xf32>
    %36 = vector.broadcast %34 : vector<1x1x128xf32> to vector<1x16x128xf32>
    %37 = arith.mulf %36, %35 : vector<1x16x128xf32>
    %38 = arith.addf %32, %37 : vector<1x16x128xf32>
    %39 = vector.extract_strided_slice %19 {offsets = [3, 0], sizes = [1, 128], strides = [1, 1]} : vector<4x128xf32> to vector<1x128xf32>
    %40 = vector.shape_cast %39 : vector<1x128xf32> to vector<1x1x128xf32>
    %c0_30 = arith.constant 0 : index
    %c3_31 = arith.constant 3 : index
    %c0_32 = arith.constant 0 : index
    %41 = vector.load %arg8[%c0_30, %c3_31, %c0_32] : memref<1x20x128xf32, #tpu.memory_space<vmem>>, vector<1x16x128xf32>
    %42 = vector.broadcast %40 : vector<1x1x128xf32> to vector<1x16x128xf32>
    %43 = arith.mulf %42, %41 : vector<1x16x128xf32>
    %44 = arith.addf %38, %43 : vector<1x16x128xf32>
    %45 = vector.shape_cast %20 : vector<1x128xf32> to vector<1x1x128xf32>
    %c0_33 = arith.constant 0 : index
    %c4 = arith.constant 4 : index
    %c0_34 = arith.constant 0 : index
    %46 = vector.load %arg8[%c0_33, %c4, %c0_34] : memref<1x20x128xf32, #tpu.memory_space<vmem>>, vector<1x16x128xf32>
    %47 = vector.broadcast %45 : vector<1x1x128xf32> to vector<1x16x128xf32>
    %48 = arith.mulf %47, %46 : vector<1x16x128xf32>
    %49 = arith.addf %44, %48 : vector<1x16x128xf32>
    %50 = arith.addf %49, %0 : vector<1x16x128xf32>
    %c0_35 = arith.constant 0 : index
    %c0_36 = arith.constant 0 : index
    %c0_37 = arith.constant 0 : index
    %51 = vector.load %arg7[%c0_35, %c0_36, %c0_37] : memref<1x16x128xf32, #tpu.memory_space<vmem>>, vector<1x16x128xf32>
    tpu.vector_store %arg7[%c0_35, %c0_36, %c0_37], %50 {strides = array<i32>} : memref<1x16x128xf32, #tpu.memory_space<vmem>>, vector<1x16x128xf32>,
    return
  }
  func.func @transform_0(%arg0: i32) -> (i32, i32, i32) {
    %c0_i32 = arith.constant 0 : i32
    %c0_i32_0 = arith.constant 0 : i32
    %c0_i32_1 = arith.constant 0 : i32
    return %arg0, %c0_i32, %c0_i32_0 : i32, i32, i32
  }
  func.func @transform_1(%arg0: i32) -> (i32, i32) {
    %c0_i32 = arith.constant 0 : i32
    %c0_i32_0 = arith.constant 0 : i32
    %c0_i32_1 = arith.constant 0 : i32
    return %c0_i32, %c0_i32_0 : i32, i32
  }
  func.func @transform_2(%arg0: i32) -> (i32, i32) {
    %c0_i32 = arith.constant 0 : i32
    %c0_i32_0 = arith.constant 0 : i32
    %c0_i32_1 = arith.constant 0 : i32
    return %c0_i32, %c0_i32_0 : i32, i32
  }
  func.func @transform_3(%arg0: i32) -> (i32, i32) {
    %c0_i32 = arith.constant 0 : i32
    %c0_i32_0 = arith.constant 0 : i32
    %c0_i32_1 = arith.constant 0 : i32
    return %c0_i32, %c0_i32_0 : i32, i32
  }
  func.func @transform_4(%arg0: i32) -> (i32, i32) {
    %c0_i32 = arith.constant 0 : i32
    %c0_i32_0 = arith.constant 0 : i32
    %c0_i32_1 = arith.constant 0 : i32
    return %c0_i32, %c0_i32_0 : i32, i32
  }
  func.func @transform_5(%arg0: i32) -> (i32, i32) {
    %c0_i32 = arith.constant 0 : i32
    %c0_i32_0 = arith.constant 0 : i32
    %c0_i32_1 = arith.constant 0 : i32
    return %c0_i32, %c0_i32_0 : i32, i32
  }
  func.func @transform_6(%arg0: i32) -> (i32, i32, i32) {
    %c0_i32 = arith.constant 0 : i32
    %c0_i32_0 = arith.constant 0 : i32
    %c0_i32_1 = arith.constant 0 : i32
    return %arg0, %c0_i32, %c0_i32_0 : i32, i32, i32
  }
}

</mosaic_0001>

<bundles_post_ra>
// kernel: tpu_custom_call.1
= control target key start
LH: loop header
LB: loop body
LE: loop exit
PB: predicated region body
PF: predicated region fallthrough
CT: control target
= control target key end

     0   :  { %11 = vsyncpa [#allocation4], 0  ;;  %s1342_s0 = inlined_call_operand.hbm [shape: f32[2,16,128], index: 0, kind: input, shape index: {}]   ;;  %s1343_s1 = inlined_call_operand.hbm [shape: bf16[128,128], index: 1, kind: input, shape index: {}]   ;;  %s1344_s2 = inlined_call_operand.vmem [shape: f32[1,128], index: 2, kind: input, shape index: {}]   ;;  %s1345_s3 = inlined_call_operand.hbm [shape: bf16[128,128], index: 3, kind: input, shape index: {}]   ;;  %s1346_s4 = inlined_call_operand.vmem [shape: f32[4,128], index: 4, kind: input, shape index: {}]   ;;  %s1347_s5 = inlined_call_operand.vmem [shape: f32[1,128], index: 5, kind: input, shape index: {}]   ;;  %s1348_s6 = inlined_call_operand.hbm [shape: f32[2,16,128], index: 6, kind: output, shape index: {}]  }
   0x1   :  { %13 = vsyncpa [#allocation4 + $0x1], 0 }
   0x2   :  { %14 = vsyncpa [#allocation7], 0 }
   0x3   :  { %15 = vsyncpa [#allocation5], 0 }
   0x4   :  { %17 = vsyncpa [#allocation5 + $0x1], 0  ;;  %s1083_s21 = smov 0   ;;  %s1085_s22 = smov 0  }
   0x5   :  { %s1087_s23 = smov 0   ;;  %s1089_s24 = smov 0  }
   0x6 LB: > { %s1104_s25 = sadd.s32 4294967295, %s1034_s24   ;;  %s691_s26 = sadd.s32 4294967294, %s1034_s24   ;;  %s1034_s24 = sphi %s1089_s24, %s1368_s24   ;;  %s1030_s23 = sphi %s1087_s23, %s1367_s23   ;;  %s1026_s22 = sphi %s1085_s22, %s1366_s22   ;;  %s1022_s21 = sphi %s1083_s21, %s1365_s21  }
   0x7   : > { %p43_p0 = scmp.ne.s32.totalorder %s1026_s22, %s1022_s21  ;;  %p1349_p1 = scmp.eq.s32.totalorder %s1104_s25, 0 }
   0x8   : > { %p178_p3 = scmp.eq.s32.totalorder %s691_s26, 1  ;;  %p692_p5 = scmp.ge.s32.totalorder %s1034_s24, 1 }
   0x9   : > { %p1113_p4 = por %p1349_p1, %p43_p0  ;;  %p185_p7 = scmp.lt.s32.totalorder %s1034_s24, 3 }
   0xa   : > { %p1118_p6 = por %p178_p3, %p43_p0  ;;  %s1036_s30 = smov [#allocation6]  }
   0xb   : > { %s1352_s27 = scalar_select %p1113_p4, 1, 0 }
   0xc   : > { %s1353_s28 = scalar_select %p1118_p6, 1, 0 }
   0xd   : > { %p1123_p8 = pnand %p692_p5, %p185_p7  ;;  %s197_s7 = sshll.u32 %s1036_s30, 4  ;;  %s1127_s7 = int_to_ptr.vmem [resolvable:$true] %s197_s7 }
   0xe   : > { %s1037_s9 = smov [#allocation8]   ;;  %s878_s13 = scalar_lea.hbm %s1343_s1, 1024 }
   0xf   : > { %p799_p9 = pneg %p1123_p8  ;;  %s213_s10 = sshll.u32 %s1037_s9, 4  ;;  %s1138_s10 = int_to_ptr.vmem [resolvable:$true] %s213_s10 }
  0x10   : > { %p879_p12 = scmp.ne.s32.totalorder %s1343_s1, %s878_s13  ;;  %p885_p5 = scmp.lt.u32.totalorder %s878_s13, %s1343_s1 }
  0x11   : > { %p1134_p11 = pnand %p799_p9, %p1349_p1 }
  0x13   : > { %p880_p13 = pneg %p1134_p11 }
  0x15   : > { %p881_p0 = pnand %p880_p13, %p879_p12 }
  0x17   : > { %p882_p3 = pneg %p881_p0 }
  0x19   : > { %p887_p7 = pnand %p885_p5, %p882_p3 }
  0x1b   : > { %890 = shalt.err (!%p887_p7)
}
  0x1c   : > { %s891_s18 = scalar_lea.vmem %s1127_s7, 1024  ;;  %p899_p2 = scmp.lt.s32.totalorder %s1127_s7, %s1127_s7 }
  0x1d   : > { %p892_p9 = scmp.ne.s32.totalorder %s1127_s7, %s891_s18  ;;  %p900_p12 = scmp.lt.s32.totalorder %s891_s18, %s891_s18 }
  0x1f   : > { %p894_p10 = pnand %p892_p9, %p880_p13  ;;  %p901_p0 = por %p900_p12, %p899_p2 }
  0x21   : > { %p895_p1 = pneg %p894_p10 }
  0x23   : > { %p902_p6 = pnand %p901_p0, %p895_p1 }
  0x25   : > { %905 = shalt.err (!%p902_p6)
}
  0x26   : > { %s1038_s19 = smov 64   ;;  %s1039_s20 = smov 4  }
  0x27   : > { %802 = dma.hbm_to_vmem [thread:$0]  (!%p1134_p11), %s1343_s1, 1024, %s1127_s7, [#allocation7], %s1038_s19, %s1038_s19, %s1039_s20  }
  0x28   : > { %s906_s12 = scalar_lea.hbm %s1345_s3, 1024 }
  0x29   : > { %p907_p2 = scmp.ne.s32.totalorder %s1345_s3, %s906_s12  ;;  %p913_p10 = scmp.lt.u32.totalorder %s906_s12, %s1345_s3 }
  0x2b   : > { %p909_p1 = pnand %p907_p2, %p880_p13 }
  0x2d   : > { %p910_p6 = pneg %p909_p1 }
  0x2f   : > { %p915_p3 = pnand %p913_p10, %p910_p6 }
  0x31   : > { %918 = shalt.err (!%p915_p3)
}
  0x32   : > { %s919_s7 = scalar_lea.vmem %s1138_s10, 1024  ;;  %p927_p12 = scmp.lt.s32.totalorder %s1138_s10, %s1138_s10 }
  0x33   : > { %p920_p5 = scmp.ne.s32.totalorder %s1138_s10, %s919_s7  ;;  %p928_p0 = scmp.lt.s32.totalorder %s919_s7, %s919_s7 }
  0x35   : > { %p922_p7 = pnand %p920_p5, %p880_p13  ;;  %p929_p2 = por %p928_p0, %p927_p12 }
  0x37   : > { %p923_p9 = pneg %p922_p7 }
  0x39   : > { %p930_p1 = pnand %p929_p2, %p923_p9 }
  0x3b   : > { %933 = shalt.err (!%p930_p1)
}
  0x3c   : > { %805 = dma.hbm_to_vmem [thread:$0]  (!%p1134_p11), %s1345_s3, 1024, %s1138_s10, [#allocation7], %s1038_s19, %s1038_s19, %s1039_s20  }
  0x3d   : > { %s1193_s26 = sadd.s32 1, %s1034_s24   ;;  %s30_s8 = sadd.s32 1, %s1030_s23 }
  0x3e   : > { %s27_s30 = ssub.s32 %s1034_s24, %s1193_s26  ;;  %p37_p13 = scmp.ne.s32.totalorder %s1030_s23, %s1026_s22 }
  0x3f   : > { %p28_p6 = scmp.eq.s32.totalorder %s27_s30, 0  ;;  %p38_p10 = scmp.eq.s32.totalorder %s1034_s24, 0 }
  0x40   : > { %p1356_p3 = scmp.eq.s32.totalorder %s1104_s25, 1  ;;  %p816_p7 = scmp.lt.s32.totalorder %s1034_s24, 2 }
  0x41   : > { %s1209_s11 = scalar_select %p28_p6, %s1030_s23, %s30_s8  }
  0x42   : > { %p1203_p5 = por %p1356_p3, %p37_p13  ;;  %p39_p9 = por %p38_p10, %p37_p13 }
  0x43   : > { %s233_s12 = sand.u32 1, %s1030_s23   ;;  %s727_s10 = sshll.u32 %s1034_s24, 8 }
  0x44   : > { %s1357_s9 = scalar_select %p1203_p5, 1, 0 }
  0x45   : > { %s696_s13 = sshll.u32 %s233_s12, 4  ;;  %s1216_s14 = scalar_lea.hbm %s1342_s0, %s727_s10 }
  0x46   : > { %s237_s15 = scalar_lea.vmem [#allocation3], %s696_s13  ;;  %p1220_p11 = pnand %p816_p7, %p39_p9 }
  0x47   : > { %s244_s16 = sshll.u32 %s237_s15, 4  ;;  %s1224_s17 = scalar_lea.sflag [#allocation4], %s233_s12  ;;  %s1218_s16 = int_to_ptr.vmem [resolvable:$true] %s244_s16 }
  0x48   : > { %s934_s18 = scalar_lea.hbm %s1216_s14, 256  ;;  %p936_p0 = pneg %p1220_p11 }
  0x49   : > { %p935_p12 = scmp.ne.s32.totalorder %s1216_s14, %s934_s18  ;;  %s939_s13 = scalar_lea.hbm %s1342_s0, 512 }
  0x4a   : > { %p940_p13 = scmp.lt.u32.totalorder %s1216_s14, %s1342_s0  ;;  %p941_p6 = scmp.lt.u32.totalorder %s939_s13, %s934_s18 }
  0x4b   : > { %p937_p2 = pnand %p936_p0, %p935_p12  ;;  %p943_p3 = scmp.lt.u32.totalorder %s934_s18, %s1216_s14 }
  0x4c   : > { %p942_p10 = por %p941_p6, %p940_p13 }
  0x4d   : > { %p938_p1 = pneg %p937_p2 }
  0x4e   : > { %p944_p7 = por %p943_p3, %p942_p10 }
  0x50   : > { %p945_p9 = pnand %p944_p7, %p938_p1 }
  0x52   : > { %948 = shalt.err (!%p945_p9)
}
  0x53   : > { %s949_s12 = scalar_lea.vmem %s1218_s16, 256  ;;  %s1040_s20 = smov [#allocation3]  }
  0x54   : > { %p950_p12 = scmp.ne.s32.totalorder %s1218_s16, %s949_s12  ;;  %s954_s15 = sshll.u32 %s1040_s20, 4  ;;  %s955_s15 = int_to_ptr.vmem [resolvable:$false] %s954_s15 }
  0x55   : > { %s956_s8 = scalar_lea.vmem %s955_s15, 512  ;;  %p957_p4 = scmp.lt.s32.totalorder %s1218_s16, %s955_s15 }
  0x56   : > { %p952_p2 = pnand %p950_p12, %p936_p0  ;;  %p958_p13 = scmp.lt.s32.totalorder %s956_s8, %s949_s12 }
  0x58   : > { %p953_p5 = pneg %p952_p2  ;;  %p959_p6 = por %p958_p13, %p957_p4 }
  0x5a   : > { %p960_p10 = pnand %p959_p6, %p953_p5 }
  0x5c   : > { %963 = shalt.err (!%p960_p10)
}
  0x5d   : > { %s1041_s18 = smov 128   ;;  %s1042_s30 = smov 8  }
  0x5e   : > { %809 = dma.hbm_to_vmem [thread:$0]  (!%p1220_p11), %s1216_s14, 256, %s1218_s16, %s1224_s17, %s1041_s18, %s1041_s18, %s1042_s30  }
  0x5f   : > { %256 = sbr.rel (%p1123_p8) target bundleno = 612 (0x264), region = 44  ;;  %s1255_s13 = sand.u32 (!%p1123_p8), 1, %s1026_s22  }
  0x60   : > { %s700_s10 = sshll.u32 (!%p1123_p8), %s1255_s13, 4  ;;  %s259_s19 = scalar_lea.sflag (!%p1123_p8), [#allocation4], %s1255_s13 }
  0x61   : > { %s1261_s12 = scalar_lea.vmem (!%p1123_p8), [#allocation3], %s700_s10  ;;  %p1359_p4 = scmp.ne.s32.totalorder (!%p1123_p8), %s1352_s27, 0 }
  0x66   : > { %1009 = dma.done.wait (%p1359_p4), %s259_s19, 256  }
  0x67   : > { %1011 = vsyncadd (%p1359_p4), %s259_s19, 4294967040  ;;  %p1360_p5 = scmp.eq.s32.totalorder %s1104_s25, 0 }
  0x69   : > { %1013 = dma.done.wait (%p1360_p5), [#allocation7], 2048   ;;  %p1361_p8 = pmov %p1360_p5 }
  0x6a   : > { %v1043_v0 = vmov 0.0   ;;  %vm1044_vm0 = vmmov 0   ;;  %v862_v1 = vld [vmem:[#allocation6] sm:$0xff]   ;;  %v863_v2 = vld [vmem:[#allocation6 + $0x8] sm:$0xff]   ;;  %v864_v3 = vld [vmem:[#allocation6 + $0x10] sm:$0xff]   ;;  %v531_v30 = vlaneseq  ;;  %s728_s20 = sshll.u32 %s1104_s25, 8 }
  0x6b   : > { %1015 = vsyncadd (%p1361_p8), [#allocation7], 4294965248  ;;  %747 = vmatprep.subr.bf16.mxu0 %v1043_v0  ;;  %523 = vst [vmem:[#allocation2] sm:$0x7] %v1043_v0  ;;  %763 = vmatprep.mubr.msk.bf16.mxu0 %vm1044_vm0, %v1043_v0  ;;  %v870_v4 = vld [vmem:[#allocation8] sm:$0xff]   ;;  %v865_v5 = vld [vmem:[#allocation6 + $0x18] sm:$0xff]   ;;  %s1295_s19 = scalar_lea.hbm %s1348_s6, %s728_s20 }
  0x6c   : > { %524 = vst [vmem:[#allocation2 + $0x13] sm:$0x1] %v1043_v0  ;;  %767 = vmatprep.subr.bf16.mxu1 %v1043_v0  ;;  %783 = vmatprep.mubr.msk.bf16.mxu1 %vm1044_vm0, %v1043_v0  ;;  %v871_v6 = vld [vmem:[#allocation8 + $0x8] sm:$0xff]   ;;  %v866_v7 = vld [vmem:[#allocation6 + $0x20] sm:$0xff]   ;;  %v872_v8 = vld [vmem:[#allocation8 + $0x10] sm:$0xff]   ;;  %v532_v31 = vshrl.u32 %v531_v30, 7 }
  0x6d   : > { %748 = vmatpush3.bf16.msra.mxu0 %v862_v1  ;;  %768 = vmatpush3.bf16.msra.mxu1 %v870_v4  ;;  %v867_v9 = vld [vmem:[#allocation6 + $0x28] sm:$0xff]   ;;  %v873_v10 = vld [vmem:[#allocation8 + $0x18] sm:$0xff]   ;;  %v868_v11 = vld [vmem:[#allocation6 + $0x30] sm:$0xff]   ;;  %s298_s15 = scalar_lea.vmem [#allocation9], %s700_s10  ;;  %s586_s25 = scalar_lea.sflag [#allocation5], %s1255_s13 }
  0x6e   : > { %749 = vmatprep.subr.bf16.mxu0 %v1043_v0  ;;  %769 = vmatprep.subr.bf16.mxu1 %v1043_v0  ;;  %v874_v12 = vld [vmem:[#allocation8 + $0x20] sm:$0xff]   ;;  %v869_v13 = vld [vmem:[#allocation6 + $0x38] sm:$0xff]   ;;  %v875_v16 = vld [vmem:[#allocation8 + $0x28] sm:$0xff]   ;;  %v533_v33 = vsub.s32 0, %v532_v31  ;;  %v543_v36 = vsub.s32 1, %v532_v31  ;;  %v553_v40 = vsub.s32 2, %v532_v31 }
  0x6f   : > { %v1272_v14 = vld [vmem:[%s1261_s12] sm:$0xff]  ;;  %v1275_v15 = vld [vmem:[%s1261_s12 + $0x8] sm:$0xff]  ;;  %v563_v42 = vsub.s32 3, %v532_v31  ;;  %s599_s8 = sshll.u32 %s298_s15, 4  ;;  %p1362_p0 = scmp.ne.s32.totalorder %s1357_s9, 0  ;;  %s1297_s8 = int_to_ptr.vmem [resolvable:$true] %s599_s8 }
  0x70   : > { %v302_v17 = vpack.c.bf16 %v1275_v15, %v1272_v14  ;;  %v876_v18 = vld [vmem:[#allocation8 + $0x30] sm:$0xff]   ;;  %v877_v19 = vld [vmem:[#allocation8 + $0x38] sm:$0xff]   ;;  %v704_v20 = vld [vmem:[%s1344_s2] ss:$0 sm:$0xff]  ;;  %s964_s10 = scalar_lea.vmem %s1297_s8, 256  ;;  %s1045_s12 = smov [#allocation9]  }
  0x71   : > { %750 = vmatpush3.bf16.msra.mxu0 %v863_v2  ;;  %770 = vmatpush3.bf16.msra.mxu1 %v871_v6  ;;  %v527_v38 = vld [vmem:[%s1346_s4] sm:$0xf]  ;;  %p965_p11 = scmp.ne.s32.totalorder %s1297_s8, %s964_s10  ;;  %s968_s27 = sshll.u32 %s1045_s12, 4  ;;  %s969_s27 = int_to_ptr.vmem [resolvable:$false] %s968_s27 }
  0x72   : > { %751 = vmatprep.subr.bf16.mxu0 %v1043_v0  ;;  %771 = vmatprep.subr.bf16.mxu1 %v1043_v0  ;;  %v534_v39 = vrot.slane %v527_v38, %v533_v33  ;;  %v544_v41 = vrot.slane %v527_v38, %v543_v36  ;;  %v554_v46 = vrot.slane %v527_v38, %v553_v40  ;;  %v721_v59 = vld [vmem:[%s1347_s5] ss:$0 sm:$0xff]  ;;  %s970_s29 = scalar_lea.vmem %s969_s27, 512  ;;  %p971_p7 = scmp.lt.s32.totalorder %s1297_s8, %s969_s27 }
  0x73   : > { %v564_v52 = vrot.slane %v527_v38, %v563_v42  ;;  %p966_p1 = pnand %p965_p11, %p1362_p0  ;;  %p972_p9 = scmp.lt.s32.totalorder %s970_s29, %s964_s10 }
  0x75   : > { %752 = vmatpush3.bf16.msra.mxu0 %v864_v3  ;;  %772 = vmatpush3.bf16.msra.mxu1 %v872_v8  ;;  %p967_p3 = pneg %p966_p1  ;;  %p973_p12 = por %p972_p9, %p971_p7 }
  0x76   : > { %753 = vmatprep.subr.bf16.mxu0 %v1043_v0  ;;  %773 = vmatprep.subr.bf16.mxu1 %v1043_v0 }
  0x77   : > { %p974_p2 = pnand %p973_p12, %p967_p3 }
  0x79   : > { %754 = vmatpush3.bf16.msra.mxu0 %v865_v5  ;;  %774 = vmatpush3.bf16.msra.mxu1 %v873_v10 }
  0x7a   : > { %755 = vmatprep.subr.bf16.mxu0 %v1043_v0  ;;  %775 = vmatprep.subr.bf16.mxu1 %v1043_v0 }
  0x7d   : > { %756 = vmatpush3.bf16.msra.mxu0 %v866_v7  ;;  %776 = vmatpush3.bf16.msra.mxu1 %v874_v12 }
  0x7e   : > { %757 = vmatprep.subr.bf16.mxu0 %v1043_v0  ;;  %777 = vmatprep.subr.bf16.mxu1 %v1043_v0 }
  0x81   : > { %758 = vmatpush3.bf16.msra.mxu0 %v867_v9  ;;  %778 = vmatpush3.bf16.msra.mxu1 %v875_v16 }
  0x82   : > { %759 = vmatprep.subr.bf16.mxu0 %v1043_v0  ;;  %779 = vmatprep.subr.bf16.mxu1 %v1043_v0 }
  0x85   : > { %760 = vmatpush3.bf16.msra.mxu0 %v868_v11  ;;  %780 = vmatpush3.bf16.msra.mxu1 %v876_v18 }
  0x86   : > { %761 = vmatprep.subr.bf16.mxu0 %v1043_v0  ;;  %781 = vmatprep.subr.bf16.mxu1 %v1043_v0 }
  0x89   : > { %762 = vmatpush3.bf16.msra.mxu0 %v869_v13  ;;  %782 = vmatpush3.bf16.msra.mxu1 %v877_v19 }
  0x8c   : > { %764 = vmatmul.mubr.bf16.vlgmr.msra.gmra.mrb[0].mxu0 %v302_v17 }
 0x15f   : > { %v408_v21 = vpop.f32.mrb[0].mxu0 }
 0x160   : > { %v409_v22 = vadd.f32 %v704_v20, %v408_v21  ;;  %v765_v23 = vpop.f32.mrb[1].mxu0 }
 0x161   : > { %v411_v24 = vpop.f32.mrb[2].mxu0 }
 0x162   : > { %v412_v25 = vadd.f32 %v704_v20, %v411_v24  ;;  %v766_v26 = vpop.f32.mrb[3].mxu0  ;;  %v415_v27 = vmax.f32 %v409_v22, 0.0 }
 0x164   : > { %v416_v28 = vmax.f32 %v412_v25, 0.0 }
 0x166   : > { %v417_v29 = vpack.c.bf16 %v416_v28, %v415_v27 }
 0x168   : > { %784 = vmatmul.mubr.bf16.vlgmr.msra.gmra.mrb[0].mxu1 %v417_v29 }
 0x23b   : > { %v516_v32 = vpop.f32.mrb[0].mxu1 }
 0x23c   : > { %525 = vst [vmem:[#allocation2 + $0x3] sm:$0xff] %v516_v32  ;;  %v785_v34 = vpop.f32.mrb[1].mxu1  ;;  %v565_v62 = vmul.f32 %v564_v52, %v516_v32 }
 0x23d   : > { %v519_v35 = vpop.f32.mrb[2].mxu1 }
 0x23e   : > { %526 = vst [vmem:[#allocation2 + $0xb] sm:$0xff] %v519_v35  ;;  %v786_v37 = vpop.f32.mrb[3].mxu1  ;;  %v566_v4 = vmul.f32 %v564_v52, %v519_v35 }
 0x243   : > { %v529_v43 = vld [vmem:[#allocation2] sm:$0xff] }
 0x244   : > { %v539_v44 = vld [vmem:[#allocation2 + $0x1] sm:$0xff]  ;;  %v535_v45 = vmul.f32 %v534_v39, %v529_v43 }
 0x245   : > { %v549_v47 = vld [vmem:[#allocation2 + $0x2] sm:$0xff]  ;;  %v545_v51 = vmul.f32 %v544_v41, %v539_v44  ;;  %v550_v54 = vld [vmem:[#allocation2 + $0xa] sm:$0xff] }
 0x246   : > { %v530_v48 = vld [vmem:[#allocation2 + $0x8] sm:$0xff]  ;;  %v537_v50 = vadd.f32 %v535_v45, %v516_v32  ;;  %v555_v56 = vmul.f32 %v554_v46, %v549_v47  ;;  %v556_v0 = vmul.f32 %v554_v46, %v550_v54 }
 0x247   : > { %v540_v49 = vld [vmem:[#allocation2 + $0x9] sm:$0xff]  ;;  %v536_v53 = vmul.f32 %v534_v39, %v530_v48 }
 0x248   : > { %v547_v55 = vadd.f32 %v545_v51, %v537_v50  ;;  %v546_v58 = vmul.f32 %v544_v41, %v540_v49  ;;  %v569_v60 = vld [vmem:[#allocation2 + $0x4] sm:$0xff]  ;;  %v570_v1 = vld [vmem:[#allocation2 + $0xc] sm:$0xff] }
 0x249   : > { %v538_v57 = vadd.f32 %v536_v53, %v519_v35  ;;  %v577_v5 = vmul.f32 %v721_v59, %v569_v60  ;;  %v578_v7 = vmul.f32 %v721_v59, %v570_v1 }
 0x24a   : > { %v557_v61 = vadd.f32 %v555_v56, %v547_v55 }
 0x24b   : > { %v548_v63 = vadd.f32 %v546_v58, %v538_v57 }
 0x24c   : > { %v567_v2 = vadd.f32 %v565_v62, %v557_v61 }
 0x24d   : > { %v558_v3 = vadd.f32 %v556_v0, %v548_v63 }
 0x24e   : > { %v579_v8 = vadd.f32 %v577_v5, %v567_v2 }
 0x24f   : > { %v568_v6 = vadd.f32 %v566_v4, %v558_v3 }
 0x250   : > { %v581_v10 = vadd.f32 %v579_v8, %v1272_v14 }
 0x251   : > { %v580_v9 = vadd.f32 %v578_v7, %v568_v6 }
 0x252   : > { %583 = vst [vmem:[%s298_s15] sm:$0xff] %v581_v10 }
 0x253   : > { %v582_v11 = vadd.f32 %v580_v9, %v1275_v15 }
 0x255   : > { %584 = vst [vmem:[%s298_s15 + $0x8] sm:$0xff] %v582_v11 }
 0x256   : > { %977 = shalt.err (!%p974_p2)
}
 0x257   : > { %s978_s14 = scalar_lea.hbm %s1295_s19, 256  ;;  %s982_s17 = scalar_lea.hbm %s1348_s6, 512 }
 0x258   : > { %p979_p13 = scmp.ne.s32.totalorder %s1295_s19, %s978_s14  ;;  %p983_p4 = scmp.lt.u32.totalorder %s1295_s19, %s1348_s6 }
 0x259   : > { %p984_p5 = scmp.lt.u32.totalorder %s982_s17, %s978_s14  ;;  %p986_p11 = scmp.lt.u32.totalorder %s978_s14, %s1295_s19 }
 0x25a   : > { %p980_p6 = pnand %p979_p13, %p1362_p0 }
 0x25b   : > { %p985_p8 = por %p984_p5, %p983_p4 }
 0x25c   : > { %p981_p10 = pneg %p980_p6 }
 0x25d   : > { %p987_p1 = por %p986_p11, %p985_p8 }
 0x25f   : > { %p988_p3 = pnand %p987_p1, %p981_p10 }
 0x261   : > { %991 = shalt.err (!%p988_p3)
}
 0x262   : > { %s1046_s18 = smov 128   ;;  %s1047_s30 = smov 8  }
 0x263   : > { %797 = dma.vmem_to_hbm [thread:$0]  (%p1362_p0), %s1297_s8, 256, %s1295_s19, %s586_s25, %s1046_s18, %s1046_s18, %s1047_s30  }
 0x264 PF: > { %s614_s10 = sand.u32 1, %s1022_s21   ;;  %p1363_p7 = scmp.ne.s32.totalorder %s1353_s28, 0 }
 0x265   : > { %p1364_p9 = scmp.ge.s32.totalorder %s1034_s24, 2  ;;  %s615_s12 = scalar_lea.sflag [#allocation5], %s614_s10 }
 0x267   : > { %p811_p12 = pnand %p1364_p9, %p1363_p7 }
 0x269   : > { %1017 = dma.done.wait (!%p811_p12), %s615_s12, 256  }
 0x26a   : > { %1019 = vsyncadd (!%p811_p12), %s615_s12, 4294967040  ;;  %p20_p2 = scmp.ge.s32.totalorder %s1193_s26, 4   ;;  %s1365_s21 = smov %s1026_s22 }
 0x26b   : > { %s1366_s22 = smov %s1030_s23  ;;  %s1367_s23 = smov %s1209_s11 }
 0x26c   : > { %s1368_s24 = smov %s1193_s26  ;;  %22 = sbr.rel (!%p20_p2) target bundleno = 6 (0x6), region = 97 }
 0x273   :  { %620 = vsyncpa [#allocation4], 1 }
 0x274   :  { %622 = vsyncpa [#allocation4 + $0x1], 1 }
 0x275   :  { %623 = vsyncpa [#allocation7], 1 }
 0x276   :  { %624 = vsyncpa [#allocation5], 1 }
 0x277   :  { %626 = vsyncpa [#allocation5 + $0x1], 1 }

</bundles_post_ra>
